<compile_context>
chip_gen: v6e
topology: v6e:2x2x1
jax: 0.10.0
libtpu: 0.0.40
codegen_flags: <defaults>
</compile_context>

<pallas_src>
import functools

import jax
import jax.numpy as jnp
from jax import lax
from jax.experimental import pallas as pl
from jax.experimental.pallas import tpu as pltpu


# ---------------------------------------------------------------------------
# Kernel: Linear -> GELU(erf) -> Linear -> LayerNorm on one (TB, Dc) x-tile.
# ---------------------------------------------------------------------------
def _mlp_proj_kernel(x_ref, w1_ref, b1_ref, w2_ref, b2_ref, g_ref, beta_ref,
                     o_ref, *, matmul_dtype):
    # Grid-invariant per-feature vectors: read each exactly once, in f32.
    b1 = b1_ref[...].astype(jnp.float32)         # (1, Dc)
    b2 = b2_ref[...].astype(jnp.float32)         # (1, Da)
    gamma = g_ref[...].astype(jnp.float32)       # (1, Da)
    beta = beta_ref[...].astype(jnp.float32)     # (1, Da)

    # Matmul operands in matmul_dtype (f32 or bf16); MXU accumulates in f32.
    x = x_ref[...].astype(matmul_dtype)          # (TB, Dc)
    w1 = w1_ref[...].astype(matmul_dtype)        # (Dc, Dc)
    w2 = w2_ref[...].astype(matmul_dtype)        # (Dc, Da)

    # ---- Linear 1: (TB, Dc) @ (Dc, Dc) + b1  (MXU, f32 accumulate) ----
    h = jnp.dot(x, w1, preferred_element_type=jnp.float32) + b1

    # ---- GELU (exact, erf-based; matches torch.nn.GELU() default), f32 ----
    h = 0.5 * h * (1.0 + lax.erf(h * 0.7071067811865476))

    # ---- Linear 2: (TB, Dc) @ (Dc, Da) + b2 ----
    y = jnp.dot(h.astype(matmul_dtype), w2,
                preferred_element_type=jnp.float32) + b2

    # ---- LayerNorm over last dim (biased variance, eps = 1e-5), f32 ----
    mu = jnp.mean(y, axis=-1, keepdims=True)
    yc = y - mu
    var = jnp.mean(yc * yc, axis=-1, keepdims=True)
    inv = lax.rsqrt(var + 1e-5)
    o_ref[...] = (yc * inv * gamma + beta).astype(o_ref.dtype)


# ---------------------------------------------------------------------------
# 2-D driver: x is (B, Dc) row-major; batch on sublanes, features on lanes.
# ---------------------------------------------------------------------------
@functools.partial(jax.jit, static_argnames=("max_tile_b", "use_bf16_matmul"))
def _mlp_proj_2d(x, w1_t, b1, w2_t, b2, gamma, beta, *,
                 max_tile_b=256, use_bf16_matmul=False):
    B, Dc = x.shape
    Da = w2_t.shape[1]
    out_dtype = x.dtype

    # --- Batch tiling: one grid step for small B; otherwise sublane-aligned
    #     tiles sized to minimize pad waste (instead of padding to 256). ---
    if B <= max_tile_b:
        num_tiles, tile_b = 1, B
    else:
        num_tiles = -(-B // max_tile_b)
        tile_b = ((-(-B // num_tiles)) + 7) // 8 * 8
    B_pad = num_tiles * tile_b
    x_in = x if B_pad == B else jnp.pad(x, ((0, B_pad - B), (0, 0)))

    # --- Optional bf16 matmul operands (halves weight/x DMA + VMEM) ---
    if use_bf16_matmul:
        matmul_dtype = jnp.bfloat16
        x_in = x_in.astype(jnp.bfloat16)
        w1_in = w1_t.astype(jnp.bfloat16)
        w2_in = w2_t.astype(jnp.bfloat16)
    else:
        matmul_dtype = jnp.float32
        w1_in, w2_in = w1_t, w2_t

    # Grid-invariant operands: constant block index -> staged once, no re-DMA
    # across grid steps.
    def _const_spec(shape):
        return pl.BlockSpec(shape, lambda i: (0, 0))

    # --- VMEM budget (conservatively assume double-buffered weights + tiles
    #     + f32 intermediates), clamped well under v7x's 64 MiB physical. ---
    op_itemsize = 2 if use_bf16_matmul else 4
    out_itemsize = jnp.dtype(out_dtype).itemsize
    weight_bytes = (Dc * Dc + Dc * Da) * op_itemsize
    vec_bytes = (Dc + 3 * Da) * 4
    io_bytes = 2 * tile_b * (Dc * op_itemsize + Da * out_itemsize)
    tmp_bytes = 2 * tile_b * (Dc + Da) * 4
    vmem_need = 2 * weight_bytes + io_bytes + tmp_bytes + 2 * vec_bytes + (1 << 20)
    vmem_limit = int(min(max(vmem_need, 32 * 1024 * 1024), 56 * 1024 * 1024))

    # --- Advisory cost estimate for the XLA scheduler ---
    cost = pl.CostEstimate(
        flops=2 * B_pad * Dc * (Dc + Da),
        transcendentals=B_pad * Dc,          # one erf per hidden activation
        bytes_accessed=(B_pad * Dc * op_itemsize + weight_bytes + vec_bytes
                        + B_pad * Da * out_itemsize),
    )

    out = pl.pallas_call(
        functools.partial(_mlp_proj_kernel, matmul_dtype=matmul_dtype),
        out_shape=jax.ShapeDtypeStruct((B_pad, Da), out_dtype),
        grid_spec=pltpu.PrefetchScalarGridSpec(
            num_scalar_prefetch=0,
            grid=(num_tiles,),
            in_specs=[
                pl.BlockSpec((tile_b, Dc), lambda i: (i, 0)),   # x tile
                _const_spec((Dc, Dc)),                          # W1^T (full)
                _const_spec((1, Dc)),                           # b1
                _const_spec((Dc, Da)),                          # W2^T (full)
                _const_spec((1, Da)),                           # b2
                _const_spec((1, Da)),                           # LN gamma
                _const_spec((1, Da)),                           # LN beta
            ],
            out_specs=pl.BlockSpec((tile_b, Da), lambda i: (i, 0)),
        ),
        compiler_params=pltpu.CompilerParams(
            dimension_semantics=("parallel",),
            vmem_limit_bytes=vmem_limit),
        cost_estimate=cost,
    )(x_in, w1_in, b1, w2_in, b2, gamma, beta)

    return out if B_pad == B else out[:B]


# ---------------------------------------------------------------------------
# Public wrapper: accepts image_embeds with any leading dims and torch-style
# 1-D parameter vectors.  Linear weights must be pre-transposed to (in, out).
# ---------------------------------------------------------------------------
def mlp_proj_model(image_embeds, w1_t, b1, w2_t, b2, gamma, beta, *,
                   max_tile_b=256, use_bf16_matmul=False):
    x = jnp.asarray(image_embeds)
    Dc = x.shape[-1]
    lead = x.shape[:-1]
    out = _mlp_proj_2d(
        x.reshape(-1, Dc),
        w1_t, jnp.reshape(b1, (1, -1)),
        w2_t, jnp.reshape(b2, (1, -1)),
        jnp.reshape(gamma, (1, -1)), jnp.reshape(beta, (1, -1)),
        max_tile_b=max_tile_b, use_bf16_matmul=use_bf16_matmul)
    return out.reshape(*lead, out.shape[-1])


# ---------------------------------------------------------------------------
# Pure-JAX reference (matches torch.nn.Sequential(Linear, GELU, Linear, LN)).
# ---------------------------------------------------------------------------
def _reference(x, w1_t, b1, w2_t, b2, gamma, beta):
    x = x.astype(jnp.float32)
    h = x @ w1_t.astype(jnp.float32) + b1.astype(jnp.float32)
    h = 0.5 * h * (1.0 + lax.erf(h * 0.7071067811865476))
    y = h @ w2_t.astype(jnp.float32) + b2.astype(jnp.float32)
    mu = jnp.mean(y, axis=-1, keepdims=True)
    var = jnp.mean((y - mu) ** 2, axis=-1, keepdims=True)
    return (y - mu) * lax.rsqrt(var + 1e-5) * gamma + beta


if __name__ == "__main__":
    # Small, module-consistent shapes:
    #   clip_embeddings_dim (Dc) = 256, cross_attention_dim (Da) = 128, B = 16
    B, Dc, Da = 16, 256, 128

    key = jax.random.PRNGKey(0)
    kx, k1, kb1, k2, kb2, kx2 = jax.random.split(key, 6)

    x = jax.random.normal(kx, (B, Dc), dtype=jnp.float32)

    # Deterministic synthetic parameters.  Linear weights pre-transposed to
    # (in, out); LayerNorm initialized like torch: gamma = 1, beta = 0.
    w1_t = jax.random.normal(k1, (Dc, Dc), dtype=jnp.float32) * 0.02
    b1 = jax.random.normal(kb1, (Dc,), dtype=jnp.float32) * 0.01
    w2_t = jax.random.normal(k2, (Dc, Da), dtype=jnp.float32) * 0.02
    b2 = jax.random.normal(kb2, (Da,), dtype=jnp.float32) * 0.01
    gamma = jnp.ones((Da,), dtype=jnp.float32)
    beta = jnp.zeros((Da,), dtype=jnp.float32)

    ref = _reference(x, w1_t, b1, w2_t, b2, gamma, beta)

    # 1) f32 matmul path, single grid step (B <= max_tile_b): exact numerics.
    out = jax.block_until_ready(
        mlp_proj_model(x, w1_t, b1, w2_t, b2, gamma, beta))
    assert out.shape == (B, Da), out.shape
    assert jnp.allclose(out, ref, atol=1e-4, rtol=1e-4), float(
        jnp.max(jnp.abs(out - ref)))

    # 2) bf16-operand matmul path (f32 accumulation): looser tolerance.
    out_bf16 = jax.block_until_ready(
        mlp_proj_model(x, w1_t, b1, w2_t, b2, gamma, beta,
                       use_bf16_matmul=True))
    assert out_bf16.shape == (B, Da), out_bf16.shape
    assert jnp.allclose(out_bf16, ref, atol=7.5e-2, rtol=5e-2), float(
        jnp.max(jnp.abs(out_bf16 - ref)))

    # 3) Multi-tile grid path (batch tiling + padding + constant-index weight
    #    blocks re-used across grid steps).
    Bl = 40
    xl = jax.random.normal(kx2, (Bl, Dc), dtype=jnp.float32)
    refl = _reference(xl, w1_t, b1, w2_t, b2, gamma, beta)
    outl = jax.block_until_ready(
        mlp_proj_model(xl, w1_t, b1, w2_t, b2, gamma, beta, max_tile_b=16))
    assert outl.shape == (Bl, Da), outl.shape
    assert jnp.allclose(outl, refl, atol=1e-4, rtol=1e-4), float(
        jnp.max(jnp.abs(outl - refl)))

    print("KERNEL_OK")
</pallas_src>

<mosaic_0001>
module attributes {stable_mosaic.version = 11 : i64} {
  func.func @_mlp_proj_kernel(%arg0: i32, %arg1: memref<16x256xf32, #tpu.memory_space<vmem>>, %arg2: memref<256x256xf32, #tpu.memory_space<vmem>>, %arg3: memref<1x256xf32, #tpu.memory_space<vmem>>, %arg4: memref<256x128xf32, #tpu.memory_space<vmem>>, %arg5: memref<1x128xf32, #tpu.memory_space<vmem>>, %arg6: memref<1x128xf32, #tpu.memory_space<vmem>>, %arg7: memref<1x128xf32, #tpu.memory_space<vmem>>, %arg8: memref<16x128xf32, #tpu.memory_space<vmem>>) attributes {dimension_semantics = [#tpu.dimension_semantics<parallel>], iteration_bounds = array<i64: 1>, scalar_prefetch = 0 : i64, scratch_operands = 0 : i64, tpu.core_type = #tpu.core_type<tc>, window_params = [{transform_indices = @transform_0, window_bounds = array<i64: 16, 256>}, {pipeline_mode = #tpu.pipeline_mode<synchronous>, transform_indices = @transform_1, window_bounds = array<i64: 256, 256>}, {pipeline_mode = #tpu.pipeline_mode<synchronous>, transform_indices = @transform_2, window_bounds = array<i64: 1, 256>}, {pipeline_mode = #tpu.pipeline_mode<synchronous>, transform_indices = @transform_3, window_bounds = array<i64: 256, 128>}, {pipeline_mode = #tpu.pipeline_mode<synchronous>, transform_indices = @transform_4, window_bounds = array<i64: 1, 128>}, {pipeline_mode = #tpu.pipeline_mode<synchronous>, transform_indices = @transform_5, window_bounds = array<i64: 1, 128>}, {pipeline_mode = #tpu.pipeline_mode<synchronous>, transform_indices = @transform_6, window_bounds = array<i64: 1, 128>}, {transform_indices = @transform_7, window_bounds = array<i64: 16, 128>}]} {
    %c0 = arith.constant 0 : index
    %c0_0 = arith.constant 0 : index
    %0 = vector.load %arg3[%c0, %c0_0] : memref<1x256xf32, #tpu.memory_space<vmem>>, vector<1x256xf32>
    %c0_1 = arith.constant 0 : index
    %c0_2 = arith.constant 0 : index
    %1 = vector.load %arg5[%c0_1, %c0_2] : memref<1x128xf32, #tpu.memory_space<vmem>>, vector<1x128xf32>
    %c0_3 = arith.constant 0 : index
    %c0_4 = arith.constant 0 : index
    %2 = vector.load %arg6[%c0_3, %c0_4] : memref<1x128xf32, #tpu.memory_space<vmem>>, vector<1x128xf32>
    %c0_5 = arith.constant 0 : index
    %c0_6 = arith.constant 0 : index
    %3 = vector.load %arg7[%c0_5, %c0_6] : memref<1x128xf32, #tpu.memory_space<vmem>>, vector<1x128xf32>
    %c0_7 = arith.constant 0 : index
    %c0_8 = arith.constant 0 : index
    %4 = vector.load %arg1[%c0_7, %c0_8] : memref<16x256xf32, #tpu.memory_space<vmem>>, vector<16x256xf32>
    %c0_9 = arith.constant 0 : index
    %c0_10 = arith.constant 0 : index
    %5 = vector.load %arg2[%c0_9, %c0_10] : memref<256x256xf32, #tpu.memory_space<vmem>>, vector<256x256xf32>
    %c0_11 = arith.constant 0 : index
    %c0_12 = arith.constant 0 : index
    %6 = vector.load %arg4[%c0_11, %c0_12] : memref<256x128xf32, #tpu.memory_space<vmem>>, vector<256x128xf32>
    %cst = arith.constant dense<0.000000e+00> : vector<16x256xf32>
    %7 = tpu.matmul %4, %5, %cst {dimension_numbers = #tpu.dot_dimension_numbers<[1], [0], [0], [1], [0, 0, 1, 1], [], []>} : vector<16x256xf32>, vector<256x256xf32>, vector<16x256xf32> -> vector<16x256xf32>
    %8 = vector.broadcast %0 : vector<1x256xf32> to vector<16x256xf32>
    %9 = arith.addf %7, %8 : vector<16x256xf32>
    %cst_13 = arith.constant 5.000000e-01 : f32
    %10 = vector.broadcast %cst_13 : f32 to vector<16x256xf32>
    %11 = arith.mulf %10, %9 : vector<16x256xf32>
    %cst_14 = arith.constant 0.707106769 : f32
    %12 = vector.broadcast %cst_14 : f32 to vector<16x256xf32>
    %13 = arith.mulf %9, %12 : vector<16x256xf32>
    %14 = math.erf %13 : vector<16x256xf32>
    %cst_15 = arith.constant 1.000000e+00 : f32
    %15 = vector.broadcast %cst_15 : f32 to vector<16x256xf32>
    %16 = arith.addf %15, %14 : vector<16x256xf32>
    %17 = arith.mulf %11, %16 : vector<16x256xf32>
    %cst_16 = arith.constant dense<0.000000e+00> : vector<16x128xf32>
    %18 = tpu.matmul %17, %6, %cst_16 {dimension_numbers = #tpu.dot_dimension_numbers<[1], [0], [0], [1], [0, 0, 1, 1], [], []>} : vector<16x256xf32>, vector<256x128xf32>, vector<16x128xf32> -> vector<16x128xf32>
    %19 = vector.broadcast %1 : vector<1x128xf32> to vector<16x128xf32>
    %20 = arith.addf %18, %19 : vector<16x128xf32>
    %cst_17 = arith.constant dense<0.000000e+00> : vector<16xf32>
    %21 = vector.multi_reduction <add>, %20, %cst_17 [1] : vector<16x128xf32> to vector<16xf32>
    %22 = vector.shape_cast %21 : vector<16xf32> to vector<16x1xf32>
    %cst_18 = arith.constant 1.280000e+02 : f32
    %23 = vector.broadcast %cst_18 : f32 to vector<16x1xf32>
    %24 = arith.divf %22, %23 : vector<16x1xf32>
    %25 = vector.broadcast %24 : vector<16x1xf32> to vector<16x128xf32>
    %26 = arith.subf %20, %25 : vector<16x128xf32>
    %27 = arith.mulf %26, %26 : vector<16x128xf32>
    %cst_19 = arith.constant dense<0.000000e+00> : vector<16xf32>
    %28 = vector.multi_reduction <add>, %27, %cst_19 [1] : vector<16x128xf32> to vector<16xf32>
    %29 = vector.shape_cast %28 : vector<16xf32> to vector<16x1xf32>
    %cst_20 = arith.constant 1.280000e+02 : f32
    %30 = vector.broadcast %cst_20 : f32 to vector<16x1xf32>
    %31 = arith.divf %29, %30 : vector<16x1xf32>
    %cst_21 = arith.constant 9.99999974E-6 : f32
    %32 = vector.broadcast %cst_21 : f32 to vector<16x1xf32>
    %33 = arith.addf %31, %32 : vector<16x1xf32>
    %34 = math.rsqrt %33 : vector<16x1xf32>
    %35 = vector.broadcast %34 : vector<16x1xf32> to vector<16x128xf32>
    %36 = arith.mulf %26, %35 : vector<16x128xf32>
    %37 = vector.broadcast %2 : vector<1x128xf32> to vector<16x128xf32>
    %38 = arith.mulf %36, %37 : vector<16x128xf32>
    %39 = vector.broadcast %3 : vector<1x128xf32> to vector<16x128xf32>
    %40 = arith.addf %38, %39 : vector<16x128xf32>
    %c0_22 = arith.constant 0 : index
    %c0_23 = arith.constant 0 : index
    %41 = vector.load %arg8[%c0_22, %c0_23] : memref<16x128xf32, #tpu.memory_space<vmem>>, vector<16x128xf32>
    tpu.vector_store %arg8[%c0_22, %c0_23], %40 {strides = array<i32>} : memref<16x128xf32, #tpu.memory_space<vmem>>, vector<16x128xf32>,
    return
  }
  func.func @transform_0(%arg0: i32) -> (i32, i32) {
    %c0_i32 = arith.constant 0 : i32
    %c0_i32_0 = arith.constant 0 : i32
    return %arg0, %c0_i32 : i32, i32
  }
  func.func @transform_1(%arg0: i32) -> (i32, i32) {
    %c0_i32 = arith.constant 0 : i32
    %c0_i32_0 = arith.constant 0 : i32
    %c0_i32_1 = arith.constant 0 : i32
    return %c0_i32, %c0_i32_0 : i32, i32
  }
  func.func @transform_2(%arg0: i32) -> (i32, i32) {
    %c0_i32 = arith.constant 0 : i32
    %c0_i32_0 = arith.constant 0 : i32
    %c0_i32_1 = arith.constant 0 : i32
    return %c0_i32, %c0_i32_0 : i32, i32
  }
  func.func @transform_3(%arg0: i32) -> (i32, i32) {
    %c0_i32 = arith.constant 0 : i32
    %c0_i32_0 = arith.constant 0 : i32
    %c0_i32_1 = arith.constant 0 : i32
    return %c0_i32, %c0_i32_0 : i32, i32
  }
  func.func @transform_4(%arg0: i32) -> (i32, i32) {
    %c0_i32 = arith.constant 0 : i32
    %c0_i32_0 = arith.constant 0 : i32
    %c0_i32_1 = arith.constant 0 : i32
    return %c0_i32, %c0_i32_0 : i32, i32
  }
  func.func @transform_5(%arg0: i32) -> (i32, i32) {
    %c0_i32 = arith.constant 0 : i32
    %c0_i32_0 = arith.constant 0 : i32
    %c0_i32_1 = arith.constant 0 : i32
    return %c0_i32, %c0_i32_0 : i32, i32
  }
  func.func @transform_6(%arg0: i32) -> (i32, i32) {
    %c0_i32 = arith.constant 0 : i32
    %c0_i32_0 = arith.constant 0 : i32
    %c0_i32_1 = arith.constant 0 : i32
    return %c0_i32, %c0_i32_0 : i32, i32
  }
  func.func @transform_7(%arg0: i32) -> (i32, i32) {
    %c0_i32 = arith.constant 0 : i32
    %c0_i32_0 = arith.constant 0 : i32
    return %arg0, %c0_i32 : i32, i32
  }
}

</mosaic_0001>

<bundles_post_ra>
// kernel: _mlp_proj_2d.1
= control target key start
LH: loop header
LB: loop body
LE: loop exit
PB: predicated region body
PF: predicated region fallthrough
CT: control target
= control target key end

     0   :  { %12 = vsyncpa [#allocation3], 0  ;;  %s645_s0 = inlined_call_operand.hbm [shape: f32[16,256], index: 0, kind: input, shape index: {}]   ;;  %s646_s1 = inlined_call_operand.hbm [shape: f32[256,256], index: 1, kind: input, shape index: {}]   ;;  %s647_s2 = inlined_call_operand.vmem [shape: f32[1,256], index: 2, kind: input, shape index: {}]   ;;  %s648_s3 = inlined_call_operand.hbm [shape: f32[256,128], index: 3, kind: input, shape index: {}]   ;;  %s649_s4 = inlined_call_operand.vmem [shape: f32[1,128], index: 4, kind: input, shape index: {}]   ;;  %s650_s5 = inlined_call_operand.vmem [shape: f32[1,128], index: 5, kind: input, shape index: {}]   ;;  %s651_s6 = inlined_call_operand.vmem [shape: f32[1,128], index: 6, kind: input, shape index: {}]   ;;  %s652_s7 = inlined_call_operand.hbm [shape: f32[16,128], index: 7, kind: output, shape index: {}]  }
   0x1   :  { %13 = vsyncpa [#allocation6], 0 }
   0x2   :  { %14 = vsyncpa [#allocation4], 0  ;;  %s567_s24 = smov [#allocation5]   ;;  %s568_s26 = smov [#allocation2]  }
   0x3   :  { %s32_s25 = sshll.u32 %s567_s24, 4  ;;  %s20_s27 = sshll.u32 %s568_s26, 4  ;;  %s33_s25 = int_to_ptr.vmem [resolvable:$true] %s32_s25  ;;  %s21_s27 = int_to_ptr.vmem [resolvable:$true] %s20_s27 }
   0x4   :  { %s489_s28 = scalar_lea.vmem %s33_s25, 8192  ;;  %p494_p1 = scmp.lt.s32.totalorder %s33_s25, %s33_s25 }
   0x5   :  { %p490_p0 = scmp.ne.s32.totalorder %s33_s25, %s489_s28  ;;  %p495_p2 = scmp.lt.s32.totalorder %s489_s28, %s489_s28 }
   0x7   :  { %p496_p3 = por %p495_p2, %p494_p1 }
   0x9   :  { %p497_p4 = pnand %p496_p3, %p490_p0 }
   0xb   :  { %500 = shalt.err (!%p497_p4)
}
   0xc   :  { %s569_s29 = smov 256   ;;  %s570_s30 = smov 16  }
   0xd   :  { %38 = dma.hbm_to_vmem [thread:$0]  %s646_s1, 8192, %s33_s25, [#allocation6], %s569_s29, %s569_s29, %s570_s30  }
   0xe   :  { %s509_s10 = scalar_lea.vmem %s21_s27, 512  ;;  %p514_p6 = scmp.lt.s32.totalorder %s21_s27, %s21_s27 }
   0xf   :  { %p510_p5 = scmp.ne.s32.totalorder %s21_s27, %s509_s10  ;;  %p515_p7 = scmp.lt.s32.totalorder %s509_s10, %s509_s10 }
  0x11   :  { %p516_p8 = por %p515_p7, %p514_p6 }
  0x13   :  { %p517_p9 = pnand %p516_p8, %p510_p5 }
  0x15   :  { %520 = shalt.err (!%p517_p9)
}
  0x16   :  { %26 = dma.hbm_to_vmem [thread:$0]  %s645_s0, 512, %s21_s27, [#allocation3], %s569_s29, %s569_s29, %s570_s30  }
  0x17   :  { %s571_s13 = smov [#allocation7]  }
  0x18   :  { %s46_s14 = sshll.u32 %s571_s13, 4  ;;  %s47_s14 = int_to_ptr.vmem [resolvable:$true] %s46_s14 }
  0x19   :  { %s529_s15 = scalar_lea.vmem %s47_s14, 4096  ;;  %p534_p11 = scmp.lt.s32.totalorder %s47_s14, %s47_s14 }
  0x1a   :  { %p530_p10 = scmp.ne.s32.totalorder %s47_s14, %s529_s15  ;;  %p535_p12 = scmp.lt.s32.totalorder %s529_s15, %s529_s15 }
  0x1c   :  { %p536_p13 = por %p535_p12, %p534_p11 }
  0x1e   :  { %p537_p0 = pnand %p536_p13, %p530_p10 }
  0x20   :  { %540 = shalt.err (!%p537_p0)
}
  0x21   :  { %s572_s1 = smov 128   ;;  %s573_s16 = smov 8  }
  0x22   :  { %52 = dma.hbm_to_vmem [thread:$0]  %s648_s3, 4096, %s47_s14, [#allocation6], %s572_s1, %s572_s1, %s573_s16  }
  0x23   :  { %561 = dma.done.wait [#allocation3], 512  }
  0x24   :  { %562 = vsyncadd [#allocation3], 4294966784 }
  0x25   :  { %563 = dma.done.wait [#allocation6], 12288  }
  0x26   :  { %564 = vsyncadd [#allocation6], 4294955008  ;;  %v107_v0 = vld [vmem:[#allocation5 + $0xf8] sm:$0xff]  ;;  %v106_v1 = vld [vmem:[#allocation5 + $0xf0] sm:$0xff]  ;;  %s574_s23 = smov [#allocation8]  }
  0x27   :  { %v105_v2 = vld [vmem:[#allocation5 + $0xe8] sm:$0xff]  ;;  %183 = vmatprep.subr.mxu0 %v107_v0  ;;  %v104_v3 = vld [vmem:[#allocation5 + $0xe0] sm:$0xff]  ;;  %v103_v4 = vld [vmem:[#allocation5 + $0xd8] sm:$0xff]  ;;  %s407_s24 = sshll.u32 %s574_s23, 4  ;;  %s408_s24 = int_to_ptr.vmem [resolvable:$true] %s407_s24 }
  0x28   :  { %184 = vmatpush1.msra.mxu0 %v106_v1  ;;  %v102_v5 = vld [vmem:[#allocation5 + $0xd0] sm:$0xff]  ;;  %v101_v6 = vld [vmem:[#allocation5 + $0xc8] sm:$0xff]  ;;  %v100_v7 = vld [vmem:[#allocation5 + $0xc0] sm:$0xff]  ;;  %s541_s25 = scalar_lea.vmem %s408_s24, 256  ;;  %p546_p2 = scmp.lt.s32.totalorder %s408_s24, %s408_s24 }
  0x29   :  { %185 = vmatprep.subr.mxu0 %v105_v2  ;;  %v99_v8 = vld [vmem:[#allocation5 + $0xb8] sm:$0xff]  ;;  %v98_v9 = vld [vmem:[#allocation5 + $0xb0] sm:$0xff]  ;;  %v97_v10 = vld [vmem:[#allocation5 + $0xa8] sm:$0xff]  ;;  %p542_p1 = scmp.ne.s32.totalorder %s408_s24, %s541_s25  ;;  %p547_p3 = scmp.lt.s32.totalorder %s541_s25, %s541_s25 }
  0x2a   :  { %186 = vmatpush1.msra.mxu0 %v104_v3  ;;  %v96_v11 = vld [vmem:[#allocation5 + $0xa0] sm:$0xff]  ;;  %v95_v12 = vld [vmem:[#allocation5 + $0x98] sm:$0xff]  ;;  %v94_v13 = vld [vmem:[#allocation5 + $0x90] sm:$0xff] }
  0x2b   :  { %187 = vmatprep.subr.mxu0 %v103_v4  ;;  %v93_v14 = vld [vmem:[#allocation5 + $0x88] sm:$0xff]  ;;  %v92_v15 = vld [vmem:[#allocation5 + $0x80] sm:$0xff]  ;;  %v91_v16 = vld [vmem:[#allocation5 + $0x78] sm:$0xff]  ;;  %p548_p4 = por %p547_p3, %p546_p2 }
  0x2c   :  { %188 = vmatpush1.msra.mxu0 %v102_v5  ;;  %v90_v17 = vld [vmem:[#allocation5 + $0x70] sm:$0xff]  ;;  %v89_v18 = vld [vmem:[#allocation5 + $0x68] sm:$0xff]  ;;  %v88_v19 = vld [vmem:[#allocation5 + $0x60] sm:$0xff] }
  0x2d   :  { %189 = vmatprep.subr.mxu0 %v101_v6  ;;  %v87_v20 = vld [vmem:[#allocation5 + $0x58] sm:$0xff]  ;;  %v86_v21 = vld [vmem:[#allocation5 + $0x50] sm:$0xff]  ;;  %v85_v22 = vld [vmem:[#allocation5 + $0x48] sm:$0xff]  ;;  %p549_p5 = pnand %p548_p4, %p542_p1 }
  0x2e   :  { %190 = vmatpush1.msra.mxu0 %v100_v7  ;;  %v84_v23 = vld [vmem:[#allocation5 + $0x40] sm:$0xff]  ;;  %v73_v24 = vld [vmem:[#allocation2 + $0x8] sm:$0xff]  ;;  %v83_v25 = vld [vmem:[#allocation5 + $0x38] sm:$0xff] }
  0x2f   :  { %191 = vmatprep.subr.mxu0 %v99_v8  ;;  %v82_v26 = vld [vmem:[#allocation5 + $0x30] sm:$0xff]  ;;  %247 = vmatprep.mubr.f32.mxu0 %v73_v24  ;;  %v171_v27 = vld [vmem:[#allocation7 + $0xf8] sm:$0xff]  ;;  %v81_v31 = vld [vmem:[#allocation5 + $0x28] sm:$0xff] }
  0x30   :  { %192 = vmatpush1.msra.mxu0 %v98_v9  ;;  %423 = vmatprep.subr.mxu1 %v171_v27  ;;  %v155_v28 = vld [vmem:[#allocation7 + $0x78] sm:$0xff]  ;;  %v170_v29 = vld [vmem:[#allocation7 + $0xf0] sm:$0xff]  ;;  %v169_v32 = vld [vmem:[#allocation7 + $0xe8] sm:$0xff] }
  0x31   :  { %193 = vmatprep.subr.mxu0 %v97_v10  ;;  %v154_v30 = vld [vmem:[#allocation7 + $0x70] sm:$0xff]  ;;  %424 = vmatpush3.msra.mxu1 %v155_v28  ;;  %v80_v33 = vld [vmem:[#allocation5 + $0x20] sm:$0xff]  ;;  %v153_v34 = vld [vmem:[#allocation7 + $0x68] sm:$0xff] }
  0x32   :  { %194 = vmatpush1.msra.mxu0 %v96_v11  ;;  %425 = vmatprep.subr.mxu1 %v170_v29  ;;  %v79_v35 = vld [vmem:[#allocation5 + $0x18] sm:$0xff]  ;;  %v78_v36 = vld [vmem:[#allocation5 + $0x10] sm:$0xff]  ;;  %v77_v37 = vld [vmem:[#allocation5 + $0x8] sm:$0xff] }
  0x33   :  { %195 = vmatprep.subr.mxu0 %v95_v12  ;;  %426 = vmatpush3.msra.mxu1 %v154_v30  ;;  %v76_v38 = vld [vmem:[#allocation5] sm:$0xff]  ;;  %v139_v39 = vld [vmem:[#allocation5 + $0x1f8] sm:$0xff]  ;;  %v138_v40 = vld [vmem:[#allocation5 + $0x1f0] sm:$0xff] }
  0x34   :  { %196 = vmatpush1.msra.mxu0 %v94_v13  ;;  %427 = vmatprep.subr.mxu1 %v169_v32  ;;  %v137_v41 = vld [vmem:[#allocation5 + $0x1e8] sm:$0xff]  ;;  %v136_v42 = vld [vmem:[#allocation5 + $0x1e0] sm:$0xff]  ;;  %v135_v43 = vld [vmem:[#allocation5 + $0x1d8] sm:$0xff] }
  0x35   :  { %197 = vmatprep.subr.mxu0 %v93_v14  ;;  %428 = vmatpush3.msra.mxu1 %v153_v34  ;;  %v134_v44 = vld [vmem:[#allocation5 + $0x1d0] sm:$0xff]  ;;  %v133_v45 = vld [vmem:[#allocation5 + $0x1c8] sm:$0xff]  ;;  %v132_v46 = vld [vmem:[#allocation5 + $0x1c0] sm:$0xff] }
  0x36   :  { %198 = vmatpush1.msra.mxu0 %v92_v15  ;;  %v131_v47 = vld [vmem:[#allocation5 + $0x1b8] sm:$0xff]  ;;  %v130_v48 = vld [vmem:[#allocation5 + $0x1b0] sm:$0xff]  ;;  %v129_v49 = vld [vmem:[#allocation5 + $0x1a8] sm:$0xff] }
  0x37   :  { %199 = vmatprep.subr.mxu0 %v91_v16  ;;  %v128_v50 = vld [vmem:[#allocation5 + $0x1a0] sm:$0xff]  ;;  %v127_v51 = vld [vmem:[#allocation5 + $0x198] sm:$0xff]  ;;  %v126_v52 = vld [vmem:[#allocation5 + $0x190] sm:$0xff] }
  0x38   :  { %200 = vmatpush1.msra.mxu0 %v90_v17  ;;  %v125_v53 = vld [vmem:[#allocation5 + $0x188] sm:$0xff]  ;;  %v124_v54 = vld [vmem:[#allocation5 + $0x180] sm:$0xff]  ;;  %v123_v55 = vld [vmem:[#allocation5 + $0x178] sm:$0xff] }
  0x39   :  { %201 = vmatprep.subr.mxu0 %v89_v18  ;;  %v122_v56 = vld [vmem:[#allocation5 + $0x170] sm:$0xff]  ;;  %v121_v57 = vld [vmem:[#allocation5 + $0x168] sm:$0xff]  ;;  %v120_v58 = vld [vmem:[#allocation5 + $0x160] sm:$0xff] }
  0x3a   :  { %202 = vmatpush1.msra.mxu0 %v88_v19  ;;  %v119_v59 = vld [vmem:[#allocation5 + $0x158] sm:$0xff]  ;;  %v118_v60 = vld [vmem:[#allocation5 + $0x150] sm:$0xff]  ;;  %v117_v61 = vld [vmem:[#allocation5 + $0x148] sm:$0xff] }
  0x3b   :  { %203 = vmatprep.subr.mxu0 %v87_v20  ;;  %v116_v62 = vld [vmem:[#allocation5 + $0x140] sm:$0xff]  ;;  %v115_v63 = vld [vmem:[#allocation5 + $0x138] sm:$0xff]  ;;  %v114_v0 = vld [vmem:[#allocation5 + $0x130] sm:$0xff] }
  0x3c   :  { %204 = vmatpush1.msra.mxu0 %v86_v21  ;;  %v113_v1 = vld [vmem:[#allocation5 + $0x128] sm:$0xff]  ;;  %v112_v2 = vld [vmem:[#allocation5 + $0x120] sm:$0xff]  ;;  %v111_v3 = vld [vmem:[#allocation5 + $0x118] sm:$0xff] }
  0x3d   :  { %205 = vmatprep.subr.mxu0 %v85_v22  ;;  %v110_v4 = vld [vmem:[#allocation5 + $0x110] sm:$0xff]  ;;  %v109_v5 = vld [vmem:[#allocation5 + $0x108] sm:$0xff]  ;;  %v108_v6 = vld [vmem:[#allocation5 + $0x100] sm:$0xff] }
  0x3e   :  { %206 = vmatpush1.msra.mxu0 %v84_v23  ;;  %v72_v7 = vld [vmem:[#allocation2] sm:$0xff]  ;;  %v75_v8 = vld [vmem:[#allocation2 + $0x18] sm:$0xff]  ;;  %v74_v9 = vld [vmem:[#allocation2 + $0x10] sm:$0xff] }
  0x3f   :  { %207 = vmatprep.subr.mxu0 %v83_v25  ;;  %v168_v10 = vld [vmem:[#allocation7 + $0xe0] sm:$0xff]  ;;  %v167_v12 = vld [vmem:[#allocation7 + $0xd8] sm:$0xff]  ;;  %v166_v14 = vld [vmem:[#allocation7 + $0xd0] sm:$0xff] }
  0x40   :  { %208 = vmatpush1.msra.mxu0 %v82_v26  ;;  %429 = vmatprep.subr.mxu1 %v168_v10  ;;  %v152_v11 = vld [vmem:[#allocation7 + $0x60] sm:$0xff]  ;;  %v151_v13 = vld [vmem:[#allocation7 + $0x58] sm:$0xff]  ;;  %v150_v15 = vld [vmem:[#allocation7 + $0x50] sm:$0xff] }
  0x41   :  { %209 = vmatprep.subr.mxu0 %v81_v31  ;;  %430 = vmatpush3.msra.mxu1 %v152_v11  ;;  %v165_v16 = vld [vmem:[#allocation7 + $0xc8] sm:$0xff]  ;;  %v164_v18 = vld [vmem:[#allocation7 + $0xc0] sm:$0xff]  ;;  %v163_v20 = vld [vmem:[#allocation7 + $0xb8] sm:$0xff] }
  0x42   :  { %210 = vmatpush1.msra.mxu0 %v80_v33  ;;  %431 = vmatprep.subr.mxu1 %v167_v12  ;;  %v149_v17 = vld [vmem:[#allocation7 + $0x48] sm:$0xff]  ;;  %v148_v19 = vld [vmem:[#allocation7 + $0x40] sm:$0xff]  ;;  %v147_v21 = vld [vmem:[#allocation7 + $0x38] sm:$0xff] }
  0x43   :  { %211 = vmatprep.subr.mxu0 %v79_v35  ;;  %432 = vmatpush3.msra.mxu1 %v151_v13  ;;  %v162_v22 = vld [vmem:[#allocation7 + $0xb0] sm:$0xff]  ;;  %v161_v24 = vld [vmem:[#allocation7 + $0xa8] sm:$0xff]  ;;  %v160_v26 = vld [vmem:[#allocation7 + $0xa0] sm:$0xff] }
  0x44   :  { %212 = vmatpush1.msra.mxu0 %v78_v36  ;;  %433 = vmatprep.subr.mxu1 %v166_v14  ;;  %v146_v23 = vld [vmem:[#allocation7 + $0x30] sm:$0xff]  ;;  %v145_v25 = vld [vmem:[#allocation7 + $0x28] sm:$0xff]  ;;  %v144_v27 = vld [vmem:[#allocation7 + $0x20] sm:$0xff]  ;;  %v173_v36 = vlaneseq }
  0x45   :  { %213 = vmatprep.subr.mxu0 %v77_v37  ;;  %434 = vmatpush3.msra.mxu1 %v150_v15  ;;  %v159_v28 = vld [vmem:[#allocation7 + $0x98] sm:$0xff]  ;;  %v158_v30 = vld [vmem:[#allocation7 + $0x90] sm:$0xff]  ;;  %v157_v32 = vld [vmem:[#allocation7 + $0x88] sm:$0xff] }
  0x46   :  { %214 = vmatpush1.msra.mxu0 %v76_v38  ;;  %435 = vmatprep.subr.mxu1 %v165_v16  ;;  %v143_v29 = vld [vmem:[#allocation7 + $0x18] sm:$0xff]  ;;  %v142_v31 = vld [vmem:[#allocation7 + $0x10] sm:$0xff]  ;;  %v141_v33 = vld [vmem:[#allocation7 + $0x8] sm:$0xff]  ;;  %v174_v37 = vshrl.u32 %v173_v36, 7 }
  0x47   :  { %215 = vmatprep.subr.mxu0 %v139_v39  ;;  %436 = vmatpush3.msra.mxu1 %v149_v17  ;;  %v156_v34 = vld [vmem:[#allocation7 + $0x80] sm:$0xff] }
  0x48   :  { %216 = vmatpush2.msra.mxu0 %v138_v40  ;;  %437 = vmatprep.subr.mxu1 %v164_v18  ;;  %v140_v35 = vld [vmem:[#allocation7] sm:$0xff]  ;;  %v175_v38 = vsub.s32 0, %v174_v37  ;;  %v179_v40 = vsub.s32 1, %v174_v37 }
  0x49   :  { %217 = vmatprep.subr.mxu0 %v137_v41  ;;  %438 = vmatpush3.msra.mxu1 %v148_v19  ;;  %v68_v39 = vld [vmem:[%s647_s2] sm:$0x3] }
  0x4a   :  { %218 = vmatpush2.msra.mxu0 %v136_v42  ;;  %439 = vmatprep.subr.mxu1 %v163_v20  ;;  %v176_v41 = vrot.slane %v68_v39, %v175_v38  ;;  %v180_v42 = vrot.slane %v68_v39, %v179_v40 }
  0x4b   :  { %219 = vmatprep.subr.mxu0 %v135_v43  ;;  %440 = vmatpush3.msra.mxu1 %v147_v21 }
  0x4c   :  { %220 = vmatpush2.msra.mxu0 %v134_v44  ;;  %441 = vmatprep.subr.mxu1 %v162_v22 }
  0x4d   :  { %221 = vmatprep.subr.mxu0 %v133_v45  ;;  %442 = vmatpush3.msra.mxu1 %v146_v23 }
  0x4e   :  { %222 = vmatpush2.msra.mxu0 %v132_v46  ;;  %443 = vmatprep.subr.mxu1 %v161_v24 }
  0x4f   :  { %223 = vmatprep.subr.mxu0 %v131_v47  ;;  %444 = vmatpush3.msra.mxu1 %v145_v25 }
  0x50   :  { %224 = vmatpush2.msra.mxu0 %v130_v48  ;;  %445 = vmatprep.subr.mxu1 %v160_v26 }
  0x51   :  { %225 = vmatprep.subr.mxu0 %v129_v49  ;;  %446 = vmatpush3.msra.mxu1 %v144_v27 }
  0x52   :  { %226 = vmatpush2.msra.mxu0 %v128_v50  ;;  %447 = vmatprep.subr.mxu1 %v159_v28 }
  0x53   :  { %227 = vmatprep.subr.mxu0 %v127_v51  ;;  %448 = vmatpush3.msra.mxu1 %v143_v29 }
  0x54   :  { %228 = vmatpush2.msra.mxu0 %v126_v52  ;;  %449 = vmatprep.subr.mxu1 %v158_v30 }
  0x55   :  { %229 = vmatprep.subr.mxu0 %v125_v53  ;;  %450 = vmatpush3.msra.mxu1 %v142_v31  ;;  %v421_v31 = vld [vmem:[%s650_s5] ss:$0 sm:$0xff] }
  0x56   :  { %230 = vmatpush2.msra.mxu0 %v124_v54  ;;  %451 = vmatprep.subr.mxu1 %v157_v32 }
  0x57   :  { %231 = vmatprep.subr.mxu0 %v123_v55  ;;  %452 = vmatpush3.msra.mxu1 %v141_v33  ;;  %v422_v33 = vld [vmem:[%s651_s6] ss:$0 sm:$0xff] }
  0x58   :  { %232 = vmatpush2.msra.mxu0 %v122_v56  ;;  %453 = vmatprep.subr.mxu1 %v156_v34 }
  0x59   :  { %233 = vmatprep.subr.mxu0 %v121_v57  ;;  %454 = vmatpush3.msra.mxu1 %v140_v35 }
  0x5a   :  { %234 = vmatpush2.msra.mxu0 %v120_v58 }
  0x5b   :  { %235 = vmatprep.subr.mxu0 %v119_v59 }
  0x5c   :  { %236 = vmatpush2.msra.mxu0 %v118_v60 }
  0x5d   :  { %237 = vmatprep.subr.mxu0 %v117_v61 }
  0x5e   :  { %238 = vmatpush2.msra.mxu0 %v116_v62 }
  0x5f   :  { %239 = vmatprep.subr.mxu0 %v115_v63 }
  0x60   :  { %240 = vmatpush2.msra.mxu0 %v114_v0 }
  0x61   :  { %241 = vmatprep.subr.mxu0 %v113_v1 }
  0x62   :  { %242 = vmatpush2.msra.mxu0 %v112_v2 }
  0x63   :  { %243 = vmatprep.subr.mxu0 %v111_v3 }
  0x64   :  { %244 = vmatpush2.msra.mxu0 %v110_v4 }
  0x65   :  { %245 = vmatprep.subr.mxu0 %v109_v5 }
  0x66   :  { %246 = vmatpush2.msra.mxu0 %v108_v6 }
  0x67   :  { %248 = vmatmul.mubr.f32.vlgmr.msra.gmra.mxu0 %v72_v7 }
  0x68   :  { %253 = vmatprep.mubr.f32.mxu0 %v75_v8 }
  0x6b   :  { %254 = vmatmul.mubr.f32.gmra.mxu0 %v74_v9  ;;  %v420_v9 = vld [vmem:[%s649_s4] ss:$0 sm:$0xff] }
 0x127   :  { %v249_v43 = vpop.f32.mrf.mxu0 }
 0x128   :  { %v250_v44 = vadd.f32 %v249_v43, %v176_v41 }
 0x129   :  { %v251_v45 = vpop.f32.mrf.mxu0 }
 0x12a   :  { %v264_v46 = vmul.f32 0.70710677, %v250_v44  ;;  %v252_v47 = vadd.f32 %v251_v45, %v180_v42  ;;  %v260_v61 = vmul.f32 0.5, %v250_v44 }
 0x12b   :  { %v255_v48 = vpop.f32.mrf.mxu0 }
 0x12c   :  { %469 = verf.f32 %v264_v46  ;;  %v265_v49 = vmul.f32 0.70710677, %v252_v47  ;;  %v256_v50 = vadd.f32 %v255_v48, %v176_v41  ;;  %v261_v58 = vmul.f32 0.5, %v252_v47 }
 0x12d   :  { %v257_v51 = vpop.f32.mrf.mxu0 }
 0x12e   :  { %471 = verf.f32 %v265_v49  ;;  %v266_v52 = vmul.f32 0.70710677, %v256_v50  ;;  %v258_v53 = vadd.f32 %v257_v51, %v180_v42  ;;  %v262_v4 = vmul.f32 0.5, %v256_v50 }
 0x130   :  { %473 = verf.f32 %v266_v52  ;;  %v267_v54 = vmul.f32 0.70710677, %v258_v53  ;;  %v263_v2 = vmul.f32 0.5, %v258_v53 }
 0x132   :  { %475 = verf.f32 %v267_v54 }
 0x139   :  { %v470_v55 = vpop.eup %469 }
 0x13a   :  { %v272_v57 = vadd.f32 1.0, %v470_v55 }
 0x13b   :  { %v472_v56 = vpop.eup %471 }
 0x13c   :  { %v273_v59 = vadd.f32 1.0, %v472_v56  ;;  %v276_v0 = vmul.f32 %v272_v57, %v260_v61 }
 0x13d   :  { %v474_v60 = vpop.eup %473 }
 0x13e   :  { %v277_v62 = vmul.f32 %v273_v59, %v261_v58  ;;  %v274_v1 = vadd.f32 1.0, %v474_v60 }
 0x13f   :  { %v476_v63 = vpop.eup %475 }
 0x140   :  { %350 = vmatprep.mubr.f32.mxu1 %v277_v62  ;;  %v275_v3 = vadd.f32 1.0, %v476_v63  ;;  %v278_v6 = vmul.f32 %v274_v1, %v262_v4 }
 0x141   :  { %351 = vmatmul.mubr.f32.vlgmr.msra.gmra.mxu1 %v276_v0 }
 0x142   :  { %v279_v5 = vmul.f32 %v275_v3, %v263_v2 }
 0x144   :  { %355 = vmatprep.mubr.f32.mxu1 %v279_v5 }
 0x145   :  { %356 = vmatmul.mubr.f32.gmra.mxu1 %v278_v6 }
 0x201   :  { %v455_v7 = vpop.f32.mrf.mxu1 }
 0x203   :  { %v456_v8 = vpop.f32.mrf.mxu1 }
 0x204   :  { %v457_v10 = vadd.f32 %v456_v8, %v455_v7 }
 0x205   :  { %v458_v11 = vpop.f32.mrf.mxu1 }
 0x206   :  { %v353_v12 = vadd.f32 %v457_v10, %v420_v9 }
 0x207   :  { %v459_v13 = vpop.f32.mrf.mxu1 }
 0x208   :  { %v460_v14 = vadd.f32 %v459_v13, %v458_v11  ;;  %361 = vadd.xlane.f32.xlu0 %v353_v12 }
 0x20a   :  { %v358_v15 = vadd.f32 %v460_v14, %v420_v9 }
 0x20c   :  { %363 = vadd.xlane.f32.xlu0 %v358_v15 }
 0x291   :  { %v362_v16 = vpop.xlane.xlu0 %361 }
 0x292   :  { %v366_v17 = vmul.f32 0.0078125, %v362_v16 }
 0x294   :  { %v368_v18 = vsub.f32 %v353_v12, %v366_v17 }
 0x295   :  { %v364_v19 = vpop.xlane.xlu0 %363 }
 0x296   :  { %v367_v20 = vmul.f32 0.0078125, %v364_v19  ;;  %v370_v21 = vmul.f32 %v368_v18, %v368_v18 }
 0x298   :  { %v369_v22 = vsub.f32 %v358_v15, %v367_v20  ;;  %372 = vadd.xlane.f32.xlu1 %v370_v21 }
 0x29a   :  { %v371_v23 = vmul.f32 %v369_v22, %v369_v22 }
 0x29c   :  { %374 = vadd.xlane.f32.xlu1 %v371_v23 }
 0x321   :  { %v373_v24 = vpop.xlane.xlu1 %372 }
 0x322   :  { %v376_v25 = vmul.f32 0.0078125, %v373_v24 }
 0x324   :  { %v378_v26 = vadd.f32 1e-05, %v376_v25 }
 0x325   :  { %v375_v27 = vpop.xlane.xlu1 %374 }
 0x326   :  { %477 = vrsqrt.f32 %v378_v26  ;;  %v377_v28 = vmul.f32 0.0078125, %v375_v27 }
 0x328   :  { %v379_v29 = vadd.f32 1e-05, %v377_v28 }
 0x32a   :  { %479 = vrsqrt.f32 %v379_v29 }
 0x333   :  { %v478_v30 = vpop.eup %477 }
 0x334   :  { %v382_v32 = vmul.f32 %v478_v30, %v368_v18 }
 0x336   :  { %v390_v34 = vmul.f32 %v421_v31, %v382_v32 }
 0x337   :  { %v480_v35 = vpop.eup %479 }
 0x338   :  { %v383_v36 = vmul.f32 %v480_v35, %v369_v22  ;;  %v398_v37 = vadd.f32 %v422_v33, %v390_v34 }
 0x33a   :  { %v391_v38 = vmul.f32 %v421_v31, %v383_v36  ;;  %400 = vst [vmem:[#allocation8] sm:$0xff] %v398_v37 }
 0x33c   :  { %v399_v39 = vadd.f32 %v422_v33, %v391_v38 }
 0x33e   :  { %401 = vst [vmem:[#allocation8 + $0x8] sm:$0xff] %v399_v39 }
 0x33f   :  { %552 = shalt.err (!%p549_p5)
}
 0x340   :  { %413 = dma.vmem_to_hbm [thread:$0]  %s408_s24, 256, %s652_s7, [#allocation4], %s572_s1, %s572_s1, %s573_s16  }
 0x341   :  { %565 = dma.done.wait [#allocation4], 256  }
 0x342   :  { %566 = vsyncadd [#allocation4], 4294967040 }
 0x343   :  { %417 = vsyncpa [#allocation3], 1 }
 0x344   :  { %418 = vsyncpa [#allocation6], 1 }
 0x345   :  { %419 = vsyncpa [#allocation4], 1 }

</bundles_post_ra>
